<compile_context>
chip_gen: v7x
topology: tpu7x:2x2x1
jax: 0.10.0
libtpu: 0.0.40
codegen_flags: <defaults>
</compile_context>

<pallas_src>
import functools

import jax
import jax.numpy as jnp
from jax import lax
from jax.experimental import pallas as pl
from jax.experimental.pallas import tpu as pltpu

LANES = 128
SUBLANES = 8


def _device_kind():
    try:
        return (jax.devices()[0].device_kind or "").lower()
    except Exception:
        return ""


def _masked_mse_kernel(x_ref, t_ref, sum_ref, cnt_ref, *, ignore_index,
                       acc_rows, block_rows, blocks_per_split, total_blocks,
                       total_rows, split_axis, has_phantom, has_edge):
    if split_axis:
        c = pl.program_id(0)   # core-split axis (CORE_PARALLEL on v7x)
        i = pl.program_id(1)   # reduction axis ("arbitrary")
    else:
        c = 0
        i = pl.program_id(0)   # reduction axis ("arbitrary")

    @pl.when(i == 0)
    def _():
        sum_ref[...] = jnp.zeros_like(sum_ref)
        cnt_ref[...] = jnp.zeros_like(cnt_ref)

    block_idx = c * blocks_per_split + i

    def accumulate(row_mask):
        # Native-dtype blocks are converted to f32 here (per block, in VMEM).
        x = x_ref[...].astype(jnp.float32)
        t = t_ref[...].astype(jnp.float32)
        # NOTE: comparison happens after f32 upcast; the sentinel must be
        # exactly representable (true for integer sentinels like -1).
        mask = t != jnp.float32(ignore_index)
        if row_mask is not None:
            mask = jnp.logical_and(mask, row_mask)
        diff = jnp.where(mask, x - t, jnp.float32(0.0))
        sq = diff * diff
        cf = mask.astype(jnp.float32)
        # (block_rows, 128) -> (acc_rows, 128) with vreg-aligned adds only; the
        # single cross-lane/sublane reduce happens once, in the wrapper.
        sum_ref[...] += jnp.sum(sq.reshape(-1, acc_rows, LANES), axis=0)
        cnt_ref[...] += jnp.sum(cf.reshape(-1, acc_rows, LANES), axis=0)

    def edge_row_mask():
        # Only the (single) ragged final block pays for this iota mask.
        row0 = block_idx * block_rows
        rows = lax.broadcasted_iota(jnp.int32, (block_rows, LANES), 0) + row0
        return rows < total_rows

    if not has_edge and not has_phantom:
        accumulate(None)
    elif has_edge and has_phantom:
        @pl.when(block_idx < total_blocks - 1)
        def _():
            accumulate(None)

        @pl.when(block_idx == total_blocks - 1)
        def _():
            accumulate(edge_row_mask())
    elif has_edge:
        @pl.when(block_idx != total_blocks - 1)
        def _():
            accumulate(None)

        @pl.when(block_idx == total_blocks - 1)
        def _():
            accumulate(edge_row_mask())
    else:  # phantom blocks possible, no ragged edge
        @pl.when(block_idx < total_blocks)
        def _():
            accumulate(None)


def masked_mse_loss(inp, tgt, reduction="mean", ignore_index=-1):
    assert inp.shape == tgt.shape, "input/target shape mismatch"
    if reduction not in ("mean", "sum"):
        # TODO(synk): reduction='none' returns a dynamically-shaped masked
        # vector in PyTorch; no static-shape Pallas equivalent.
        raise NotImplementedError("reduction='none' not supported")

    x = inp.reshape(-1)
    t = tgt.reshape(-1)
    n = int(x.size)
    if n == 0:
        z = jnp.float32(0.0)
        return z / z if reduction == "mean" else z

    kind = _device_kind()
    is_v7 = "v7" in kind
    # 8192 rows = 4 MiB f32 / 2 MiB bf16 per input block; x2 inputs x2 buffers
    # = 16 MiB (f32) resident -> fits v6e/v7x 32 MiB scoped default.  Cap at
    # 4096 rows (8 MiB resident) on v5e / unknown chips (16 MiB default).
    default_rows = 8192 if (is_v7 or "v6" in kind) else 4096

    # Lane-align.  Common NCHW/transformer sizes need no pad; the rare ragged
    # or tiny case gets a minimal pad to the next 1024-element boundary, with
    # target padded to ignore_index so padded elements never contribute.
    tile = SUBLANES * LANES  # 1024
    if n % LANES != 0 or n < tile:
        pad = (-n) % tile
        x = jnp.pad(x, (0, pad))
        t = jnp.pad(t, (0, pad), constant_values=ignore_index)

    m = int(x.size) // LANES
    x2 = x.reshape(m, LANES)
    t2 = t.reshape(m, LANES)

    # Wide partial accumulators (32 rows) break the per-block dependent vadd
    # chain into independent chains; fall back to 8 rows for tiny inputs.
    acc_rows = 32 if m >= 32 else SUBLANES
    block_rows = min(default_rows, (m // acc_rows) * acc_rows)
    total_blocks = -(-m // block_rows)
    has_edge = (m % block_rows) != 0

    # Core split only where it buys bandwidth (v7x has 2 TensorCores).
    splits = 2 if (is_v7 and total_blocks >= 2) else 1
    bpc = -(-total_blocks // splits)
    has_phantom = splits * bpc > total_blocks

    if splits == 1:
        grid = (total_blocks,)
        in_map = lambda i: (i, 0)
        out_map = lambda i: (0, 0)
        dim_sems = ("arbitrary",)
    else:
        grid = (splits, bpc)
        last = total_blocks - 1
        if has_phantom:
            # Clamp so phantom steps re-read an in-bounds block; their compute
            # is skipped entirely inside the kernel.
            in_map = lambda c, i: (jnp.minimum(c * bpc + i, last), 0)
        else:
            in_map = lambda c, i: (c * bpc + i, 0)
        out_map = lambda c, i: (c, 0)
        dim_sems = (getattr(pltpu, "CORE_PARALLEL", pltpu.PARALLEL),
                    pltpu.ARBITRARY)

    kernel = functools.partial(
        _masked_mse_kernel,
        ignore_index=float(ignore_index),
        acc_rows=acc_rows,
        block_rows=block_rows,
        blocks_per_split=bpc,
        total_blocks=total_blocks,
        total_rows=m,
        split_axis=(splits > 1),
        has_phantom=has_phantom,
        has_edge=has_edge,
    )

    bytes_in = m * LANES * (jnp.dtype(x2.dtype).itemsize
                            + jnp.dtype(t2.dtype).itemsize)
    cost = pl.CostEstimate(
        flops=6 * m * LANES,
        transcendentals=0,
        bytes_accessed=int(bytes_in + 2 * splits * acc_rows * LANES * 4),
    )

    out_rows = splits * acc_rows
    sums, cnts = pl.pallas_call(
        kernel,
        out_shape=(
            jax.ShapeDtypeStruct((out_rows, LANES), jnp.float32),
            jax.ShapeDtypeStruct((out_rows, LANES), jnp.float32),
        ),
        grid_spec=pltpu.PrefetchScalarGridSpec(
            num_scalar_prefetch=0,
            grid=grid,
            in_specs=[
                pl.BlockSpec((block_rows, LANES), in_map),
                pl.BlockSpec((block_rows, LANES), in_map),
            ],
            out_specs=[
                pl.BlockSpec((acc_rows, LANES), out_map),
                pl.BlockSpec((acc_rows, LANES), out_map),
            ],
        ),
        compiler_params=pltpu.CompilerParams(dimension_semantics=dim_sems),
        cost_estimate=cost,
    )(x2, t2)

    ssum = jnp.sum(sums)
    # Per-lane f32 count partials are exact while each slot stays < 2^24.
    cnt = jnp.sum(cnts)

    if reduction == "mean":
        # 0/0 -> nan matches torch's mean over an empty selection.
        return ssum / cnt
    return ssum


class MaskedMSELoss:
    def __init__(self, reduction="mean", ignore_index=-1):
        self.reduction = reduction
        self.ignore_index = ignore_index

    def __call__(self, inp, tgt):
        return masked_mse_loss(inp, tgt, self.reduction, self.ignore_index)


def _reference(inp, tgt, ignore_index=-1.0):
    inp = inp.astype(jnp.float32)
    tgt = tgt.astype(jnp.float32)
    mask = tgt != ignore_index
    return jnp.sum(jnp.where(mask, (inp - tgt) ** 2, 0.0)) / jnp.sum(
        mask.astype(jnp.float32))


if __name__ == "__main__":
    key = jax.random.PRNGKey(0)
    k1, k2, k3, k4, k5, k6, k7, k8, k9 = jax.random.split(key, 9)

    loss_fn = MaskedMSELoss(reduction="mean", ignore_index=-1)

    # NCHW inputs: batch=2, channels=4, spatial=16x16 (aligned path, no pad).
    B, C, H, W = 2, 4, 16, 16
    inp = jax.random.normal(k1, (B, C, H, W), dtype=jnp.float32)
    tgt = jax.random.normal(k2, (B, C, H, W), dtype=jnp.float32)
    ign = jax.random.uniform(k3, (B, C, H, W)) < 0.25
    tgt = jnp.where(ign, jnp.float32(-1.0), tgt)

    loss = loss_fn(inp, tgt)
    jax.block_until_ready(loss)
    ref = _reference(inp, tgt)
    assert jnp.allclose(loss, ref, rtol=1e-5, atol=1e-6), (loss, ref)

    # Ragged shape (exercises the minimal-pad + edge-block masking path).
    shp = (3, 5, 7, 11)
    inp2 = jax.random.normal(k4, shp, dtype=jnp.float32)
    tgt2 = jax.random.normal(k5, shp, dtype=jnp.float32)
    ign2 = jax.random.uniform(k6, shp) < 0.25
    tgt2 = jnp.where(ign2, jnp.float32(-1.0), tgt2)

    loss2 = loss_fn(inp2, tgt2)
    jax.block_until_ready(loss2)
    ref2 = _reference(inp2, tgt2)
    assert jnp.allclose(loss2, ref2, rtol=1e-5, atol=1e-6), (loss2, ref2)

    # bf16 inputs (native-dtype path: no wrapper upcast, per-block f32 convert).
    shp3 = (2, 4, 32, 32)
    inp3 = jax.random.normal(k7, shp3, dtype=jnp.bfloat16)
    tgt3 = jax.random.normal(k8, shp3, dtype=jnp.bfloat16)
    ign3 = jax.random.uniform(k9, shp3) < 0.25
    tgt3 = jnp.where(ign3, jnp.bfloat16(-1.0), tgt3)

    loss3 = loss_fn(inp3, tgt3)
    jax.block_until_ready(loss3)
    ref3 = _reference(inp3, tgt3)
    assert jnp.allclose(loss3, ref3, rtol=1e-4, atol=1e-5), (loss3, ref3)

    print("KERNEL_OK")
</pallas_src>

<mosaic_0001>
module attributes {stable_mosaic.version = 11 : i64} {
  func.func @_masked_mse_kernel(%arg0: i32, %arg1: memref<16x128xf32, #tpu.memory_space<vmem>>, %arg2: memref<16x128xf32, #tpu.memory_space<vmem>>, %arg3: memref<8x128xf32, #tpu.memory_space<vmem>>, %arg4: memref<8x128xf32, #tpu.memory_space<vmem>>) attributes {dimension_semantics = [#tpu.dimension_semantics<arbitrary>], iteration_bounds = array<i64: 1>, scalar_prefetch = 0 : i64, scratch_operands = 0 : i64, tpu.core_type = #tpu.core_type<tc>, window_params = [{transform_indices = @transform_0, window_bounds = array<i64: 16, 128>}, {transform_indices = @transform_1, window_bounds = array<i64: 16, 128>}, {pipeline_mode = #tpu.pipeline_mode<synchronous>, transform_indices = @transform_2, window_bounds = array<i64: 8, 128>}, {pipeline_mode = #tpu.pipeline_mode<synchronous>, transform_indices = @transform_3, window_bounds = array<i64: 8, 128>}]} {
    %c0_i32 = arith.constant 0 : i32
    %0 = arith.cmpi eq, %arg0, %c0_i32 : i32
    %1 = arith.extui %0 : i1 to i32
    %c0_i32_0 = arith.constant 0 : i32
    %2 = arith.cmpi ne, %1, %c0_i32_0 : i32
    scf.if %2 {
      %cst_15 = arith.constant 0.000000e+00 : f32
      %23 = vector.broadcast %cst_15 : f32 to vector<8x128xf32>
      %c0_16 = arith.constant 0 : index
      %c0_17 = arith.constant 0 : index
      %24 = vector.load %arg3[%c0_16, %c0_17] : memref<8x128xf32, #tpu.memory_space<vmem>>, vector<8x128xf32>
      tpu.vector_store %arg3[%c0_16, %c0_17], %23 {strides = array<i32>} : memref<8x128xf32, #tpu.memory_space<vmem>>, vector<8x128xf32>,
      %cst_18 = arith.constant 0.000000e+00 : f32
      %25 = vector.broadcast %cst_18 : f32 to vector<8x128xf32>
      %c0_19 = arith.constant 0 : index
      %c0_20 = arith.constant 0 : index
      %26 = vector.load %arg4[%c0_19, %c0_20] : memref<8x128xf32, #tpu.memory_space<vmem>>, vector<8x128xf32>
      tpu.vector_store %arg4[%c0_19, %c0_20], %25 {strides = array<i32>} : memref<8x128xf32, #tpu.memory_space<vmem>>, vector<8x128xf32>,
    } else {
    }
    %c0 = arith.constant 0 : index
    %c0_1 = arith.constant 0 : index
    %3 = vector.load %arg1[%c0, %c0_1] : memref<16x128xf32, #tpu.memory_space<vmem>>, vector<16x128xf32>
    %c0_2 = arith.constant 0 : index
    %c0_3 = arith.constant 0 : index
    %4 = vector.load %arg2[%c0_2, %c0_3] : memref<16x128xf32, #tpu.memory_space<vmem>>, vector<16x128xf32>
    %cst = arith.constant -1.000000e+00 : f32
    %5 = vector.broadcast %cst : f32 to vector<16x128xf32>
    %6 = arith.cmpf one, %4, %5 : vector<16x128xf32>
    %7 = arith.subf %3, %4 : vector<16x128xf32>
    %cst_4 = arith.constant 0.000000e+00 : f32
    %8 = vector.broadcast %cst_4 : f32 to vector<16x128xf32>
    %9 = arith.select %6, %7, %8 : vector<16x128xi1>, vector<16x128xf32>
    %10 = arith.mulf %9, %9 : vector<16x128xf32>
    %11 = arith.extui %6 : vector<16x128xi1> to vector<16x128xi32>
    %12 = arith.sitofp %11 : vector<16x128xi32> to vector<16x128xf32>
    %c0_5 = arith.constant 0 : index
    %c0_6 = arith.constant 0 : index
    %13 = vector.load %arg3[%c0_5, %c0_6] : memref<8x128xf32, #tpu.memory_space<vmem>>, vector<8x128xf32>
    %14 = vector.shape_cast %10 : vector<16x128xf32> to vector<2x8x128xf32>
    %cst_7 = arith.constant dense<0.000000e+00> : vector<8x128xf32>
    %15 = vector.multi_reduction <add>, %14, %cst_7 [0] : vector<2x8x128xf32> to vector<8x128xf32>
    %16 = arith.addf %13, %15 : vector<8x128xf32>
    %c0_8 = arith.constant 0 : index
    %c0_9 = arith.constant 0 : index
    %17 = vector.load %arg3[%c0_8, %c0_9] : memref<8x128xf32, #tpu.memory_space<vmem>>, vector<8x128xf32>
    tpu.vector_store %arg3[%c0_8, %c0_9], %16 {strides = array<i32>} : memref<8x128xf32, #tpu.memory_space<vmem>>, vector<8x128xf32>,
    %c0_10 = arith.constant 0 : index
    %c0_11 = arith.constant 0 : index
    %18 = vector.load %arg4[%c0_10, %c0_11] : memref<8x128xf32, #tpu.memory_space<vmem>>, vector<8x128xf32>
    %19 = vector.shape_cast %12 : vector<16x128xf32> to vector<2x8x128xf32>
    %cst_12 = arith.constant dense<0.000000e+00> : vector<8x128xf32>
    %20 = vector.multi_reduction <add>, %19, %cst_12 [0] : vector<2x8x128xf32> to vector<8x128xf32>
    %21 = arith.addf %18, %20 : vector<8x128xf32>
    %c0_13 = arith.constant 0 : index
    %c0_14 = arith.constant 0 : index
    %22 = vector.load %arg4[%c0_13, %c0_14] : memref<8x128xf32, #tpu.memory_space<vmem>>, vector<8x128xf32>
    tpu.vector_store %arg4[%c0_13, %c0_14], %21 {strides = array<i32>} : memref<8x128xf32, #tpu.memory_space<vmem>>, vector<8x128xf32>,
    return
  }
  func.func @transform_0(%arg0: i32) -> (i32, i32) {
    %c0_i32 = arith.constant 0 : i32
    %c0_i32_0 = arith.constant 0 : i32
    return %arg0, %c0_i32 : i32, i32
  }
  func.func @transform_1(%arg0: i32) -> (i32, i32) {
    %c0_i32 = arith.constant 0 : i32
    %c0_i32_0 = arith.constant 0 : i32
    return %arg0, %c0_i32 : i32, i32
  }
  func.func @transform_2(%arg0: i32) -> (i32, i32) {
    %c0_i32 = arith.constant 0 : i32
    %c0_i32_0 = arith.constant 0 : i32
    %c0_i32_1 = arith.constant 0 : i32
    return %c0_i32, %c0_i32_0 : i32, i32
  }
  func.func @transform_3(%arg0: i32) -> (i32, i32) {
    %c0_i32 = arith.constant 0 : i32
    %c0_i32_0 = arith.constant 0 : i32
    %c0_i32_1 = arith.constant 0 : i32
    return %c0_i32, %c0_i32_0 : i32, i32
  }
}

</mosaic_0001>

<bundles_post_ra>
// kernel: tpu_custom_call.1
= control target key start
LH: loop header
LB: loop body
LE: loop exit
PB: predicated region body
PF: predicated region fallthrough
CT: control target
= control target key end

     0   :  { %9 = vsyncpa [#allocation3], 0  ;;  %s283_s0 = inlined_call_operand.hbm [shape: f32[16,128], index: 0, kind: input, shape index: {}]   ;;  %s284_s1 = inlined_call_operand.hbm [shape: f32[16,128], index: 1, kind: input, shape index: {}]   ;;  %s285_s2 = inlined_call_operand.hbm [shape: f32[8,128], index: 2, kind: output, shape index: {0}]   ;;  %s286_s3 = inlined_call_operand.hbm [shape: f32[8,128], index: 3, kind: output, shape index: {1}]  }
   0x1   :  { %10 = vsyncpa [#allocation6], 0 }
   0x2   :  { %11 = vsyncpa [#allocation4], 0 }
   0x3   :  { %12 = vsyncpa [#allocation9], 0  ;;  %s208_s12 = smov [#allocation2]   ;;  %s112_s16 = scalar_lea.hbm %s283_s0, 256 }
   0x4   :  { %s18_s13 = sshll.u32 %s208_s12, 4  ;;  %p113_p0 = scmp.ne.s32.totalorder %s283_s0, %s112_s16  ;;  %s19_s13 = int_to_ptr.vmem [resolvable:$true] %s18_s13 }
   0x5   :  { %p116_p1 = scmp.lt.u32.totalorder %s112_s16, %s283_s0 }
   0x7   :  { %p118_p2 = pnand %p116_p1, %p113_p0 }
   0x9   :  { %121 = shalt.err (!%p118_p2)
}
   0xa   :  { %s122_s21 = scalar_lea.vmem %s19_s13, 256  ;;  %p127_p4 = scmp.lt.s32.totalorder %s19_s13, %s19_s13 }
   0xb   :  { %p123_p3 = scmp.ne.s32.totalorder %s19_s13, %s122_s21  ;;  %p128_p5 = scmp.lt.s32.totalorder %s122_s21, %s122_s21 }
   0xd   :  { %p129_p6 = por %p128_p5, %p127_p4 }
   0xf   :  { %p130_p7 = pnand %p129_p6, %p123_p3 }
  0x11   :  { %133 = shalt.err (!%p130_p7)
}
  0x12   :  { %s209_s22 = smov 128   ;;  %s210_s23 = smov 8  }
  0x13   :  { %24 = dma.hbm_to_vmem [thread:$0]  %s283_s0, 256, %s19_s13, [#allocation3], %s209_s22, %s209_s22, %s210_s23  }
  0x14   :  { %s211_s26 = smov [#allocation5]   ;;  %s134_s30 = scalar_lea.hbm %s284_s1, 256 }
  0x15   :  { %s30_s27 = sshll.u32 %s211_s26, 4  ;;  %p135_p8 = scmp.ne.s32.totalorder %s284_s1, %s134_s30  ;;  %s31_s27 = int_to_ptr.vmem [resolvable:$true] %s30_s27 }
  0x16   :  { %p138_p9 = scmp.lt.u32.totalorder %s134_s30, %s284_s1 }
  0x18   :  { %p140_p10 = pnand %p138_p9, %p135_p8 }
  0x1a   :  { %143 = shalt.err (!%p140_p10)
}
  0x1b   :  { %s144_s8 = scalar_lea.vmem %s31_s27, 256  ;;  %p149_p12 = scmp.lt.s32.totalorder %s31_s27, %s31_s27 }
  0x1c   :  { %p145_p11 = scmp.ne.s32.totalorder %s31_s27, %s144_s8  ;;  %p150_p13 = scmp.lt.s32.totalorder %s144_s8, %s144_s8 }
  0x1e   :  { %p151_p0 = por %p150_p13, %p149_p12 }
  0x20   :  { %p152_p1 = pnand %p151_p0, %p145_p11 }
  0x22   :  { %155 = shalt.err (!%p152_p1)
}
  0x23   :  { %36 = dma.hbm_to_vmem [thread:$0]  %s284_s1, 256, %s31_s27, [#allocation6], %s209_s22, %s209_s22, %s210_s23  }
  0x24   :  { %200 = dma.done.wait [#allocation3], 256  }
  0x25   :  { %201 = vsyncadd [#allocation3], 4294967040 }
  0x26   :  { %202 = dma.done.wait [#allocation6], 256  }
  0x27   :  { %203 = vsyncadd [#allocation6], 4294967040  ;;  %v49_v0 = vld [vmem:[#allocation2] sm:$0xff]  ;;  %v50_v1 = vld [vmem:[#allocation2 + $0x8] sm:$0xff]  ;;  %v212_v6 = vmov 0.0   ;;  %s213_s10 = smov [#allocation8]  }
  0x28   :  { %v51_v2 = vld [vmem:[#allocation5] sm:$0xff]  ;;  %v52_v3 = vld [vmem:[#allocation5 + $0x8] sm:$0xff]  ;;  %s89_s11 = sshll.u32 %s213_s10, 4  ;;  %s214_s1 = smov [#allocation7]   ;;  %s90_s11 = int_to_ptr.vmem [resolvable:$true] %s89_s11 }
  0x29   :  { %vm53_vm0 = vcmp.ne.f32.partialorder %v51_v2, -1.0  ;;  %v55_v4 = vsub.f32 %v49_v0, %v51_v2  ;;  %vm54_vm1 = vcmp.ne.f32.partialorder %v52_v3, -1.0  ;;  %v56_v5 = vsub.f32 %v50_v1, %v52_v3  ;;  %s79_s12 = sshll.u32 %s214_s1, 4  ;;  %s156_s13 = scalar_lea.vmem %s90_s11, 128  ;;  %s80_s12 = int_to_ptr.vmem [resolvable:$true] %s79_s12 }
  0x2a   :  { %v103_v7 = vsel %vm53_vm0, 1.0, %v212_v6  ;;  %v104_v9 = vsel %vm54_vm1, 1.0, %v212_v6  ;;  %p157_p2 = scmp.ne.s32.totalorder %s90_s11, %s156_s13  ;;  %p161_p3 = scmp.lt.s32.totalorder %s90_s11, %s90_s11 }
  0x2b   :  { %v57_v8 = vsel %vm53_vm0, %v55_v4, 0.0  ;;  %v58_v10 = vsel %vm54_vm1, %v56_v5, 0.0  ;;  %v70_v12 = vadd.f32 %v104_v9, %v103_v7  ;;  %p162_p4 = scmp.lt.s32.totalorder %s156_s13, %s156_s13 }
  0x2c   :  { %v59_v11 = vmul.f32 %v57_v8, %v57_v8  ;;  %v60_v13 = vmul.f32 %v58_v10, %v58_v10 }
  0x2d   :  { %72 = vst [vmem:[#allocation8] sm:$0xff] %v70_v12  ;;  %p163_p5 = por %p162_p4, %p161_p3 }
  0x2e   :  { %v66_v14 = vadd.f32 %v60_v13, %v59_v11 }
  0x2f   :  { %p164_p6 = pnand %p163_p5, %p157_p2 }
  0x31   :  { %167 = shalt.err (!%p164_p6)
}
  0x32   :  { %s168_s16 = scalar_lea.hbm %s286_s3, 128 }
  0x33   :  { %p169_p7 = scmp.ne.s32.totalorder %s286_s3, %s168_s16  ;;  %p172_p8 = scmp.lt.u32.totalorder %s168_s16, %s286_s3 }
  0x35   :  { %p174_p9 = pnand %p172_p8, %p169_p7 }
  0x37   :  { %177 = shalt.err (!%p174_p9)
}
  0x38   :  { %92 = dma.vmem_to_hbm [thread:$0]  %s90_s11, 128, %s286_s3, [#allocation9]   ;;  %68 = vst [vmem:[#allocation7] sm:$0xff] %v66_v14 }
  0x39   :  { %s178_s23 = scalar_lea.vmem %s80_s12, 128  ;;  %p183_p11 = scmp.lt.s32.totalorder %s80_s12, %s80_s12 }
  0x3a   :  { %p179_p10 = scmp.ne.s32.totalorder %s80_s12, %s178_s23  ;;  %p184_p12 = scmp.lt.s32.totalorder %s178_s23, %s178_s23 }
  0x3c   :  { %p185_p13 = por %p184_p12, %p183_p11 }
  0x3e   :  { %p186_p0 = pnand %p185_p13, %p179_p10 }
  0x40   :  { %189 = shalt.err (!%p186_p0)
}
  0x41   :  { %s190_s26 = scalar_lea.hbm %s285_s2, 128 }
  0x42   :  { %p191_p1 = scmp.ne.s32.totalorder %s285_s2, %s190_s26  ;;  %p194_p2 = scmp.lt.u32.totalorder %s190_s26, %s285_s2 }
  0x44   :  { %p196_p3 = pnand %p194_p2, %p191_p1 }
  0x46   :  { %199 = shalt.err (!%p196_p3)
}
  0x47   :  { %82 = dma.vmem_to_hbm [thread:$0]  %s80_s12, 128, %s285_s2, [#allocation4]  }
  0x48   :  { %204 = dma.done.wait [#allocation4], 128  }
  0x49   :  { %205 = vsyncadd [#allocation4], 4294967168 }
  0x4a   :  { %206 = dma.done.wait [#allocation9], 128  }
  0x4b   :  { %207 = vsyncadd [#allocation9], 4294967168 }
  0x4c   :  { %99 = vsyncpa [#allocation3], 1 }
  0x4d   :  { %100 = vsyncpa [#allocation6], 1 }
  0x4e   :  { %101 = vsyncpa [#allocation4], 1 }
  0x4f   :  { %102 = vsyncpa [#allocation9], 1 }

</bundles_post_ra>
